<compile_context>
chip_gen: v7x
topology: tpu7x:2x2x1
jax: 0.10.0
libtpu: 0.0.40
codegen_flags: <defaults>
</compile_context>

<pallas_src>
import functools

import jax
import jax.numpy as jnp
import numpy as np
from jax.experimental import pallas as pl
from jax.experimental.pallas import tpu as pltpu


def _make_pool_matrix(ho, wo, hp, wp):
    """Flattened 2x2 avg-pool matrix (ho*wo, hp*wp) with 0.25 entries (numpy, host)."""
    a = np.zeros((hp, ho), np.float32)
    rows = np.arange(hp)
    a[rows, 2 * rows] = 0.5
    a[rows, 2 * rows + 1] = 0.5
    # Row-major vec identity: vec(A X A^T) = (A (x) A) vec(X); for row-vector operands
    # x7_rows = x1_rows @ kron(A, A).T
    return np.kron(a, a).T.astype(np.float32)  # (ho*wo, hp*wp)


def _model_kernel(w_ref, b_ref, x_ref, pool_ref, x5_ref, x7_ref, *, n, cout):
    # w_ref   : SMEM (Cout,)        ConvTranspose2d 1x1 weights (Cin == 1)
    # b_ref   : SMEM (Cout,)        bias
    # x_ref   : VMEM (N, F)         border-cropped input, spatial flattened (F = Ho*Wo)
    # pool_ref: VMEM (F, Fp)        flattened 2x2 avg-pool matrix (Fp = Hp*Wp)
    # x5_ref  : VMEM (Cout*N, F)    leaky-selected x1
    # x7_ref  : VMEM (Cout*N, Fp)   pooled x1
    x = x_ref[...]                                              # (N, F)

    # Pool FIRST: avgpool commutes with the per-channel affine (weights sum to 1),
    # so one small MXU matmul on the raw input replaces Cout channel-stacked matmuls.
    xp = jnp.dot(
        x,
        pool_ref[...],
        preferred_element_type=jnp.float32,
        precision=jax.lax.Precision.HIGHEST,
    )                                                           # (N, Fp)

    # Per-channel affine + leaky select on the VPU; direct slice stores, no concat.
    for o in range(cout):
        w_o = w_ref[o]
        b_o = b_ref[o]
        x1_o = x * w_o + b_o                                    # (N, F)
        x5_ref[pl.ds(o * n, n), :] = jnp.where(
            x1_o > 0, x1_o, x1_o * jnp.float32(0.7))
        x7_ref[pl.ds(o * n, n), :] = xp * w_o + b_o

    # x8 = tanh(x5) is computed in the torch forward but never used -> dead code.


def _forward_impl(x4, weight, bias):
    """x4: (N, 1, H, W) f32 NCHW. weight: (Cin=1, Cout, 1, 1). bias: (Cout,).

    Returns (x7, x5):
        x7: (N, Cout, (H-2)//2, (W-2)//2)  -- AvgPool2d(2,2) of x1
        x5: (N, Cout, H-2, W-2)            -- leaky-selected x1
    """
    n, cin, h, w = x4.shape
    assert cin == 1, "module is ConvTranspose2d(1, 3, 1)"
    cout = weight.shape[1]
    ho, wo = h - 2, w - 2          # ConvTranspose2d(k=1, s=1, p=1) crops 1 px/border
    hp, wp = ho // 2, wo // 2
    f, fp = ho * wo, hp * wp

    # Crop + flatten -> lane-dense (N, F) slab (fused under jit with everything else).
    xf = x4[:, 0, 1:h - 1, 1:w - 1].reshape(n, f).astype(jnp.float32)

    w_vec = weight.reshape(cin, cout)[0].astype(jnp.float32)     # (Cout,)
    b_vec = bias.astype(jnp.float32)                             # (Cout,)

    # numpy-built pooling constant -> folded into the jitted executable (no per-call
    # host construction, no scatter/kron dispatches).
    pool = jnp.asarray(_make_pool_matrix(ho, wo, hp, wp))        # (F, Fp)

    kernel = functools.partial(_model_kernel, n=n, cout=cout)

    x5_flat, x7_flat = pl.pallas_call(
        kernel,
        out_shape=(
            jax.ShapeDtypeStruct((cout * n, f), jnp.float32),    # x5 (flat)
            jax.ShapeDtypeStruct((cout * n, fp), jnp.float32),   # x7 (flat)
        ),
        in_specs=[
            pl.BlockSpec(memory_space=pltpu.MemorySpace.SMEM),   # w_vec
            pl.BlockSpec(memory_space=pltpu.MemorySpace.SMEM),   # b_vec
            pl.BlockSpec(memory_space=pltpu.MemorySpace.VMEM),   # xf
            pl.BlockSpec(memory_space=pltpu.MemorySpace.VMEM),   # pool
        ],
        out_specs=(
            pl.BlockSpec(memory_space=pltpu.MemorySpace.VMEM),
            pl.BlockSpec(memory_space=pltpu.MemorySpace.VMEM),
        ),
    )(w_vec, b_vec, xf, pool)

    # Rows are ordered (channel, image); restore NCHW (tiny, fused under jit).
    x5 = x5_flat.reshape(cout, n, ho, wo).transpose(1, 0, 2, 3)
    x7 = x7_flat.reshape(cout, n, hp, wp).transpose(1, 0, 2, 3)
    return x7, x5


model_forward = jax.jit(_forward_impl)


def _reference(x4, weight, bias):
    n, cin, h, w = x4.shape
    cout = weight.shape[1]
    ho, wo = h - 2, w - 2
    x_crop = x4[:, :, 1:h - 1, 1:w - 1]
    x1 = jnp.einsum("nihw,io->nohw", x_crop, weight.reshape(cin, cout))
    x1 = x1 + bias[None, :, None, None]
    x7 = x1.reshape(n, cout, ho // 2, 2, wo // 2, 2).mean(axis=(3, 5))
    x5 = jnp.where(x1 > 0, x1, x1 * 0.7)
    return x7, x5


if __name__ == "__main__":
    key = jax.random.PRNGKey(0)
    k1, k2, k3 = jax.random.split(key, 3)

    # Shapes consistent with the torch module: x4 = torch.randn(8, 1, 16, 16)
    x4 = jax.random.normal(k1, (8, 1, 16, 16), dtype=jnp.float32)
    # ConvTranspose2d(1, 3, 1): weight (in=1, out=3, 1, 1), bias (3,)
    weight = jax.random.normal(k2, (1, 3, 1, 1), dtype=jnp.float32) * 0.5
    bias = jax.random.normal(k3, (3,), dtype=jnp.float32) * 0.1

    x7, x5 = model_forward(x4, weight, bias)
    jax.block_until_ready((x7, x5))

    r7, r5 = _reference(x4, weight, bias)
    assert x7.shape == (8, 3, 7, 7) and x5.shape == (8, 3, 14, 14)
    assert jnp.allclose(x7, r7, atol=1e-5, rtol=1e-5)
    assert jnp.allclose(x5, r5, atol=1e-5, rtol=1e-5)

    print("KERNEL_OK")
</pallas_src>

<mosaic_0001>
module attributes {stable_mosaic.version = 11 : i64} {
  func.func @_model_kernel(%arg0: memref<3xf32, #tpu.memory_space<smem>>, %arg1: memref<3xf32, #tpu.memory_space<smem>>, %arg2: memref<8x196xf32, #tpu.memory_space<vmem>>, %arg3: memref<196x49xf32, #tpu.memory_space<vmem>>, %arg4: memref<24x196xf32, #tpu.memory_space<vmem>>, %arg5: memref<24x49xf32, #tpu.memory_space<vmem>>) attributes {dimension_semantics = [], scalar_prefetch = 0 : i64, scratch_operands = 0 : i64, tpu.core_type = #tpu.core_type<tc>} {
    %c0 = arith.constant 0 : index
    %c0_0 = arith.constant 0 : index
    %0 = vector.load %arg2[%c0, %c0_0] : memref<8x196xf32, #tpu.memory_space<vmem>>, vector<8x196xf32>
    %c0_1 = arith.constant 0 : index
    %c0_2 = arith.constant 0 : index
    %1 = vector.load %arg3[%c0_1, %c0_2] : memref<196x49xf32, #tpu.memory_space<vmem>>, vector<196x49xf32>
    %cst = arith.constant dense<0.000000e+00> : vector<8x49xf32>
    %2 = tpu.matmul %0, %1, %cst {dimension_numbers = #tpu.dot_dimension_numbers<[1], [0], [0], [1], [0, 0, 1, 1], [], []>, precision = #tpu.contract_precision<fp32>} : vector<8x196xf32>, vector<196x49xf32>, vector<8x49xf32> -> vector<8x49xf32>
    %c0_3 = arith.constant 0 : index
    %3 = memref.load %arg0[%c0_3] : memref<3xf32, #tpu.memory_space<smem>>
    %c0_4 = arith.constant 0 : index
    %4 = memref.load %arg1[%c0_4] : memref<3xf32, #tpu.memory_space<smem>>
    %5 = vector.broadcast %3 : f32 to vector<8x196xf32>
    %6 = arith.mulf %0, %5 : vector<8x196xf32>
    %7 = vector.broadcast %4 : f32 to vector<8x196xf32>
    %8 = arith.addf %6, %7 : vector<8x196xf32>
    %cst_5 = arith.constant 0.000000e+00 : f32
    %9 = vector.broadcast %cst_5 : f32 to vector<8x196xf32>
    %10 = arith.cmpf ogt, %8, %9 : vector<8x196xf32>
    %cst_6 = arith.constant 0.699999988 : f32
    %11 = vector.broadcast %cst_6 : f32 to vector<8x196xf32>
    %12 = arith.mulf %8, %11 : vector<8x196xf32>
    %13 = arith.select %10, %8, %12 : vector<8x196xi1>, vector<8x196xf32>
    %c0_7 = arith.constant 0 : index
    %c0_8 = arith.constant 0 : index
    %14 = vector.load %arg4[%c0_7, %c0_8] : memref<24x196xf32, #tpu.memory_space<vmem>>, vector<8x196xf32>
    tpu.vector_store %arg4[%c0_7, %c0_8], %13 {strides = array<i32>} : memref<24x196xf32, #tpu.memory_space<vmem>>, vector<8x196xf32>,
    %15 = vector.broadcast %3 : f32 to vector<8x49xf32>
    %16 = arith.mulf %2, %15 : vector<8x49xf32>
    %17 = vector.broadcast %4 : f32 to vector<8x49xf32>
    %18 = arith.addf %16, %17 : vector<8x49xf32>
    %c0_9 = arith.constant 0 : index
    %c0_10 = arith.constant 0 : index
    %19 = vector.load %arg5[%c0_9, %c0_10] : memref<24x49xf32, #tpu.memory_space<vmem>>, vector<8x49xf32>
    tpu.vector_store %arg5[%c0_9, %c0_10], %18 {strides = array<i32>} : memref<24x49xf32, #tpu.memory_space<vmem>>, vector<8x49xf32>,
    %c1 = arith.constant 1 : index
    %20 = memref.load %arg0[%c1] : memref<3xf32, #tpu.memory_space<smem>>
    %c1_11 = arith.constant 1 : index
    %21 = memref.load %arg1[%c1_11] : memref<3xf32, #tpu.memory_space<smem>>
    %22 = vector.broadcast %20 : f32 to vector<8x196xf32>
    %23 = arith.mulf %0, %22 : vector<8x196xf32>
    %24 = vector.broadcast %21 : f32 to vector<8x196xf32>
    %25 = arith.addf %23, %24 : vector<8x196xf32>
    %cst_12 = arith.constant 0.000000e+00 : f32
    %26 = vector.broadcast %cst_12 : f32 to vector<8x196xf32>
    %27 = arith.cmpf ogt, %25, %26 : vector<8x196xf32>
    %cst_13 = arith.constant 0.699999988 : f32
    %28 = vector.broadcast %cst_13 : f32 to vector<8x196xf32>
    %29 = arith.mulf %25, %28 : vector<8x196xf32>
    %30 = arith.select %27, %25, %29 : vector<8x196xi1>, vector<8x196xf32>
    %c8 = arith.constant 8 : index
    %c0_14 = arith.constant 0 : index
    %31 = vector.load %arg4[%c8, %c0_14] : memref<24x196xf32, #tpu.memory_space<vmem>>, vector<8x196xf32>
    tpu.vector_store %arg4[%c8, %c0_14], %30 {strides = array<i32>} : memref<24x196xf32, #tpu.memory_space<vmem>>, vector<8x196xf32>,
    %32 = vector.broadcast %20 : f32 to vector<8x49xf32>
    %33 = arith.mulf %2, %32 : vector<8x49xf32>
    %34 = vector.broadcast %21 : f32 to vector<8x49xf32>
    %35 = arith.addf %33, %34 : vector<8x49xf32>
    %c8_15 = arith.constant 8 : index
    %c0_16 = arith.constant 0 : index
    %36 = vector.load %arg5[%c8_15, %c0_16] : memref<24x49xf32, #tpu.memory_space<vmem>>, vector<8x49xf32>
    tpu.vector_store %arg5[%c8_15, %c0_16], %35 {strides = array<i32>} : memref<24x49xf32, #tpu.memory_space<vmem>>, vector<8x49xf32>,
    %c2 = arith.constant 2 : index
    %37 = memref.load %arg0[%c2] : memref<3xf32, #tpu.memory_space<smem>>
    %c2_17 = arith.constant 2 : index
    %38 = memref.load %arg1[%c2_17] : memref<3xf32, #tpu.memory_space<smem>>
    %39 = vector.broadcast %37 : f32 to vector<8x196xf32>
    %40 = arith.mulf %0, %39 : vector<8x196xf32>
    %41 = vector.broadcast %38 : f32 to vector<8x196xf32>
    %42 = arith.addf %40, %41 : vector<8x196xf32>
    %cst_18 = arith.constant 0.000000e+00 : f32
    %43 = vector.broadcast %cst_18 : f32 to vector<8x196xf32>
    %44 = arith.cmpf ogt, %42, %43 : vector<8x196xf32>
    %cst_19 = arith.constant 0.699999988 : f32
    %45 = vector.broadcast %cst_19 : f32 to vector<8x196xf32>
    %46 = arith.mulf %42, %45 : vector<8x196xf32>
    %47 = arith.select %44, %42, %46 : vector<8x196xi1>, vector<8x196xf32>
    %c16 = arith.constant 16 : index
    %c0_20 = arith.constant 0 : index
    %48 = vector.load %arg4[%c16, %c0_20] : memref<24x196xf32, #tpu.memory_space<vmem>>, vector<8x196xf32>
    tpu.vector_store %arg4[%c16, %c0_20], %47 {strides = array<i32>} : memref<24x196xf32, #tpu.memory_space<vmem>>, vector<8x196xf32>,
    %49 = vector.broadcast %37 : f32 to vector<8x49xf32>
    %50 = arith.mulf %2, %49 : vector<8x49xf32>
    %51 = vector.broadcast %38 : f32 to vector<8x49xf32>
    %52 = arith.addf %50, %51 : vector<8x49xf32>
    %c16_21 = arith.constant 16 : index
    %c0_22 = arith.constant 0 : index
    %53 = vector.load %arg5[%c16_21, %c0_22] : memref<24x49xf32, #tpu.memory_space<vmem>>, vector<8x49xf32>
    tpu.vector_store %arg5[%c16_21, %c0_22], %52 {strides = array<i32>} : memref<24x49xf32, #tpu.memory_space<vmem>>, vector<8x49xf32>,
    return
  }
}

</mosaic_0001>

<bundles_post_ra>
// kernel: squeeze.1
= control target key start
LH: loop header
LB: loop body
LE: loop exit
PB: predicated region body
PF: predicated region fallthrough
CT: control target
= control target key end

     0   :  { %vm6_vm0 = vcmask 1043458   ;;  %vm10_vm1 = vcmask 1045508   ;;  %vm14_vm2 = vcmask 1047558   ;;  %s64_s6 = smov 3  ;;  %s67_s7 = smov 12  ;;  %vm54_vm3 = vcmask 15360   ;;  %s699_s0 = inlined_call_operand.vmem [shape: f32[8,1,14,14], index: 0, kind: input, shape index: {}]   ;;  %s700_s1 = inlined_call_operand.vmem [shape: f32[8,196], index: 1, kind: output, shape index: {}]  }
   0x1   :  { %v340_v0 = vld [vmem:[%s699_s0 + $0x8] ss:$16 sm:%s64_s6]   ;;  %s72_s12 = smov 48  ;;  %s77_s13 = smov 192  ;;  %vm16_vm4 = vcmask 113664   ;;  %vm58_vm5 = vcmask 97280  }
   0x2   :  { %v341_v1 = vld [vmem:[%s699_s0 + $0x8] ss:$16 sm:%s67_s7]   ;;  %s86_s18 = smov 3  ;;  %s89_s21 = smov 12  ;;  %vm61_vm6 = vcmask 1048560   ;;  %vm83_vm7 = vcmask 1032064  }
   0x3   :  { %v70_v2 = vsel %vm6_vm0, %v341_v1, %v340_v0  ;;  %v342_v3 = vld [vmem:[%s699_s0 + $0x8] ss:$16 sm:%s72_s12]   ;;  %v344_v6 = vld [vmem:[%s699_s0 + $0x7] ss:$16 sm:%s86_s18]   ;;  %s94_s22 = smov 48  ;;  %s99_s27 = smov 192 }
   0x4   :  { %v343_v4 = vld [vmem:[%s699_s0 + $0x8] ss:$16 sm:%s77_s13]   ;;  %v75_v5 = vsel %vm10_vm1, %v342_v3, %v70_v2  ;;  %v345_v8 = vld [vmem:[%s699_s0 + $0x7] ss:$16 sm:%s89_s21]   ;;  %s405_s28 = smov 112   ;;  %s19_s2 = smov 3 }
   0x5   :  { %v80_v7 = vsel %vm14_vm2, %v343_v4, %v75_v5  ;;  %v346_v9 = vld [vmem:[%s699_s0 + $0x7] ss:$16 sm:%s94_s22]   ;;  %v92_v10 = vsel %vm6_vm0, %v345_v8, %v344_v6  ;;  %s22_s3 = smov 12  ;;  %v331_v13 = vld [vmem:[%s699_s0 + $0x9] ss:$16 sm:%s19_s2]   ;;  %s27_s8 = smov 48 }
   0x6   :  { %81 = vrot.lane.b32.xlu0 %v80_v7, %s405_s28  ;;  %v347_v11 = vld [vmem:[%s699_s0 + $0x7] ss:$16 sm:%s99_s27]   ;;  %v97_v12 = vsel %vm10_vm1, %v346_v9, %v92_v10  ;;  %s32_s9 = smov 192  ;;  %s37_s14 = smov 3  ;;  %vm105_vm8 = vcmask 917264   ;;  %vm127_vm9 = vcmask 802464  }
   0x7   :  { %v332_v14 = vld [vmem:[%s699_s0 + $0x9] ss:$16 sm:%s22_s3]   ;;  %v102_v15 = vsel %vm14_vm2, %v347_v11, %v97_v12  ;;  %s40_s15 = smov 12  ;;  %s406_s16 = smov 98   ;;  %vm149_vm10 = vcmask 687664   ;;  %vm171_vm11 = vcmask 572864  }
   0x8   :  { %v25_v16 = vsel %vm6_vm0, %v332_v14, %v331_v13  ;;  %v333_v17 = vld [vmem:[%s699_s0 + $0x9] ss:$16 sm:%s27_s8]   ;;  %103 = vrot.lane.b32.xlu1 %v102_v15, %s406_s16  ;;  %s45_s19 = smov 48  ;;  %s50_s20 = smov 192  ;;  %vm193_vm12 = vcmask 556464   ;;  %vm216_vm13 = vcmask 458064  }
   0x9   :  { %v334_v18 = vld [vmem:[%s699_s0 + $0x9] ss:$16 sm:%s32_s9]   ;;  %v30_v19 = vsel %vm10_vm1, %v333_v17, %v25_v16  ;;  %s108_s25 = smov 3  ;;  %s111_s30 = smov 12  ;;  %vm238_vm14 = vcmask 441664   ;;  %vm261_vm15 = vcmask 343264  }
   0xa   :  { %v335_v20 = vld [vmem:[%s699_s0 + $0x9] ss:$16 sm:%s37_s14]   ;;  %v35_v23 = vsel %vm14_vm2, %v334_v18, %v30_v19  ;;  %v348_v26 = vld [vmem:[%s699_s0 + $0x6] ss:$16 sm:%s108_s25]   ;;  %s116_s2 = smov 48  ;;  %s121_s7 = smov 192 }
   0xb   :  { %v336_v21 = vld [vmem:[%s699_s0 + $0x9] ss:$16 sm:%s40_s15]   ;;  %v349_v28 = vld [vmem:[%s699_s0 + $0x6] ss:$16 sm:%s111_s30]   ;;  %s130_s10 = smov 3  ;;  %s133_s11 = smov 12 }
   0xc   :  { %v337_v22 = vld [vmem:[%s699_s0 + $0x9] ss:$16 sm:%s45_s19]   ;;  %v43_v24 = vsel %vm6_vm0, %v336_v21, %v335_v20  ;;  %v350_v29 = vld [vmem:[%s699_s0 + $0x6] ss:$16 sm:%s116_s2]   ;;  %v114_v31 = vsel %vm6_vm0, %v349_v28, %v348_v26  ;;  %s138_s16 = smov 48  ;;  %s143_s17 = smov 192 }
   0xd   :  { %v338_v25 = vld [vmem:[%s699_s0 + $0x9] ss:$16 sm:%s50_s20]   ;;  %v48_v27 = vsel %vm10_vm1, %v337_v22, %v43_v24  ;;  %v351_v32 = vld [vmem:[%s699_s0 + $0x6] ss:$16 sm:%s121_s7]   ;;  %v119_v34 = vsel %vm10_vm1, %v350_v29, %v114_v31  ;;  %s407_s18 = smov 126   ;;  %s152_s21 = smov 3 }
   0xe   :  { %v53_v30 = vsel %vm14_vm2, %v338_v25, %v48_v27  ;;  %v352_v35 = vld [vmem:[%s699_s0 + $0x5] ss:$16 sm:%s130_s10]   ;;  %v124_v37 = vsel %vm14_vm2, %v351_v32, %v119_v34  ;;  %s408_s22 = smov 84   ;;  %s155_s25 = smov 12  ;;  %v356_v43 = vld [vmem:[%s699_s0 + $0x4] ss:$16 sm:%s152_s21]  }
   0xf   :  { %v55_v33 = vsel %vm54_vm3, %v53_v30, %v35_v23  ;;  %v353_v36 = vld [vmem:[%s699_s0 + $0x5] ss:$16 sm:%s133_s11]   ;;  %125 = vrot.lane.b32.xlu1 %v124_v37, %s408_s22  ;;  %s160_s26 = smov 48  ;;  %s165_s2 = smov 192 }
  0x10   :  { %56 = vrot.lane.b32.xlu0 %v55_v33, %s407_s18  ;;  %v136_v38 = vsel %vm6_vm0, %v353_v36, %v352_v35  ;;  %v354_v39 = vld [vmem:[%s699_s0 + $0x5] ss:$16 sm:%s138_s16]   ;;  %s174_s7 = smov 3  ;;  %s177_s8 = smov 12 }
  0x11   :  { %v141_v40 = vsel %vm10_vm1, %v354_v39, %v136_v38  ;;  %v355_v41 = vld [vmem:[%s699_s0 + $0x5] ss:$16 sm:%s143_s17]   ;;  %v357_v44 = vld [vmem:[%s699_s0 + $0x4] ss:$16 sm:%s155_s25]   ;;  %s409_s9 = smov 70   ;;  %s182_s12 = smov 48 }
  0x12   :  { %v146_v42 = vsel %vm14_vm2, %v355_v41, %v141_v40  ;;  %v158_v45 = vsel %vm6_vm0, %v357_v44, %v356_v43  ;;  %v358_v46 = vld [vmem:[%s699_s0 + $0x4] ss:$16 sm:%s160_s26]   ;;  %v360_v49 = vld [vmem:[%s699_s0 + $0xd] ss:$16 sm:%s174_s7]   ;;  %s187_s13 = smov 192  ;;  %s197_s18 = smov 3 }
  0x13   :  { %v359_v47 = vld [vmem:[%s699_s0 + $0x4] ss:$16 sm:%s165_s2]   ;;  %v163_v48 = vsel %vm10_vm1, %v358_v46, %v158_v45  ;;  %v361_v51 = vld [vmem:[%s699_s0 + $0xd] ss:$16 sm:%s177_s8]   ;;  %s410_s19 = smov 56   ;;  %s200_s22 = smov 12 }
  0x14   :  { %147 = vrot.lane.b32.xlu0 %v146_v42, %s409_s9  ;;  %v168_v50 = vsel %vm14_vm2, %v359_v47, %v163_v48  ;;  %v362_v52 = vld [vmem:[%s699_s0 + $0xd] ss:$16 sm:%s182_s12]   ;;  %v180_v53 = vsel %vm6_vm0, %v361_v51, %v360_v49  ;;  %s205_s23 = smov 48  ;;  %s210_s28 = smov 192 }
  0x15   :  { %169 = vrot.lane.b32.xlu1 %v168_v50, %s410_s19  ;;  %v363_v54 = vld [vmem:[%s699_s0 + $0xd] ss:$16 sm:%s187_s13]   ;;  %v185_v55 = vsel %vm10_vm1, %v362_v52, %v180_v53  ;;  %s219_s4 = smov 3  ;;  %s222_s5 = smov 12 }
  0x16   :  { %v365_v56 = vld [vmem:[%s699_s0 + $0x3] ss:$16 sm:%s197_s18]   ;;  %v190_v58 = vsel %vm14_vm2, %v363_v54, %v185_v55  ;;  %s411_s6 = smov 54   ;;  %v369_v63 = vld [vmem:[%s699_s0 + $0xc] ss:$16 sm:%s219_s4]   ;;  %s227_s9 = smov 48 }
  0x17   :  { %v366_v57 = vld [vmem:[%s699_s0 + $0x3] ss:$16 sm:%s200_s22]   ;;  %s232_s10 = smov 192  ;;  %v370_v1 = vld [vmem:[%s699_s0 + $0xc] ss:$16 sm:%s222_s5]   ;;  %s242_s15 = smov 3 }
  0x18   :  { %v203_v59 = vsel %vm6_vm0, %v366_v57, %v365_v56  ;;  %v367_v60 = vld [vmem:[%s699_s0 + $0x3] ss:$16 sm:%s205_s23]   ;;  %191 = vrot.lane.b32.xlu0 %v190_v58, %s411_s6  ;;  %s412_s16 = smov 42   ;;  %v225_v3 = vsel %vm6_vm0, %v370_v1, %v369_v63  ;;  %s245_s19 = smov 12 }
  0x19   :  { %v368_v61 = vld [vmem:[%s699_s0 + $0x3] ss:$16 sm:%s210_s28]   ;;  %v208_v62 = vsel %vm10_vm1, %v367_v60, %v203_v59  ;;  %v371_v2 = vld [vmem:[%s699_s0 + $0xc] ss:$16 sm:%s227_s9]   ;;  %s250_s20 = smov 48  ;;  %s255_s25 = smov 192 }
  0x1a   :  { %v213_v0 = vsel %vm14_vm2, %v368_v61, %v208_v62  ;;  %v372_v4 = vld [vmem:[%s699_s0 + $0xc] ss:$16 sm:%s232_s10]   ;;  %v230_v5 = vsel %vm10_vm1, %v371_v2, %v225_v3  ;;  %v374_v6 = vld [vmem:[%s699_s0 + $0x2] ss:$16 sm:%s242_s15]   ;;  %s264_s30 = smov 3  ;;  %s267_s2 = smov 12 }
  0x1b   :  { %214 = vrot.lane.b32.xlu1 %v213_v0, %s412_s16  ;;  %v375_v7 = vld [vmem:[%s699_s0 + $0x2] ss:$16 sm:%s245_s19]   ;;  %v235_v8 = vsel %vm14_vm2, %v372_v4, %v230_v5  ;;  %s413_s3 = smov 40   ;;  %s272_s6 = smov 48 }
  0x1c   :  { %v248_v9 = vsel %vm6_vm0, %v375_v7, %v374_v6  ;;  %v376_v10 = vld [vmem:[%s699_s0 + $0x2] ss:$16 sm:%s250_s20]   ;;  %236 = vrot.lane.b32.xlu0 %v235_v8, %s413_s3  ;;  %s277_s7 = smov 192  ;;  %s287_s12 = smov 3 }
  0x1d   :  { %v377_v11 = vld [vmem:[%s699_s0 + $0x2] ss:$16 sm:%s255_s25]   ;;  %v253_v12 = vsel %vm10_vm1, %v376_v10, %v248_v9  ;;  %v378_v13 = vld [vmem:[%s699_s0 + $0xb] ss:$16 sm:%s264_s30]   ;;  %s414_s13 = smov 28   ;;  %s290_s16 = smov 12 }
  0x1e   :  { %v258_v14 = vsel %vm14_vm2, %v377_v11, %v253_v12  ;;  %v379_v15 = vld [vmem:[%s699_s0 + $0xb] ss:$16 sm:%s267_s2]   ;;  %s295_s17 = smov 48  ;;  %v383_v20 = vld [vmem:[%s699_s0 + $0x1] ss:$16 sm:%s287_s12]   ;;  %s300_s22 = smov 192 }
  0x1f   :  { %v380_v16 = vld [vmem:[%s699_s0 + $0xb] ss:$16 sm:%s272_s6]   ;;  %259 = vrot.lane.b32.xlu1 %v258_v14, %s414_s13  ;;  %v270_v17 = vsel %vm6_vm0, %v379_v15, %v378_v13  ;;  %s309_s27 = smov 3  ;;  %s312_s28 = smov 12 }
  0x20   :  { %v381_v18 = vld [vmem:[%s699_s0 + $0xb] ss:$16 sm:%s277_s7]   ;;  %v275_v19 = vsel %vm10_vm1, %v380_v16, %v270_v17  ;;  %v384_v21 = vld [vmem:[%s699_s0 + $0x1] ss:$16 sm:%s290_s16]   ;;  %s415_s29 = smov 26   ;;  %s317_s3 = smov 48 }
  0x21   :  { %v280_v22 = vsel %vm14_vm2, %v381_v18, %v275_v19  ;;  %v293_v23 = vsel %vm6_vm0, %v384_v21, %v383_v20  ;;  %v385_v24 = vld [vmem:[%s699_s0 + $0x1] ss:$16 sm:%s295_s17]   ;;  %v387_v27 = vld [vmem:[%s699_s0 + $0xa] ss:$16 sm:%s309_s27]   ;;  %s322_s4 = smov 192  ;;  %s2_s9 = smov 3 }
  0x22   :  { %v386_v25 = vld [vmem:[%s699_s0 + $0x1] ss:$16 sm:%s300_s22]   ;;  %281 = vrot.lane.b32.xlu0 %v280_v22, %s415_s29  ;;  %v298_v26 = vsel %vm10_vm1, %v385_v24, %v293_v23  ;;  %s416_s10 = smov 14   ;;  %s4_s13 = smov 12 }
  0x23   :  { %v303_v28 = vsel %vm14_vm2, %v386_v25, %v298_v26  ;;  %v388_v29 = vld [vmem:[%s699_s0 + $0xa] ss:$16 sm:%s312_s28]   ;;  %s8_s14 = smov 48  ;;  %s12_s15 = smov 192  ;;  %v3_v34 = vld [vmem:[%s699_s0] ss:$16 sm:%s2_s9]  }
  0x24   :  { %v389_v30 = vld [vmem:[%s699_s0 + $0xa] ss:$16 sm:%s317_s3]   ;;  %304 = vrot.lane.b32.xlu1 %v303_v28, %s416_s10  ;;  %v315_v31 = vsel %vm6_vm0, %v388_v29, %v387_v27 }
  0x25   :  { %v390_v32 = vld [vmem:[%s699_s0 + $0xa] ss:$16 sm:%s322_s4]   ;;  %v320_v33 = vsel %vm10_vm1, %v389_v30, %v315_v31  ;;  %v5_v35 = vld [vmem:[%s699_s0] ss:$16 sm:%s4_s13]  }
  0x26   :  { %v325_v36 = vsel %vm14_vm2, %v390_v32, %v320_v33  ;;  %v7_v37 = vsel %vm6_vm0, %v5_v35, %v3_v34  ;;  %v9_v38 = vld [vmem:[%s699_s0] ss:$16 sm:%s8_s14]   ;;  %vm283_vm0 = vcmask 326864  }
  0x27   :  { %v13_v39 = vld [vmem:[%s699_s0] ss:$16 sm:%s12_s15]   ;;  %s417_s0 = smov 12   ;;  %v11_v40 = vsel %vm10_vm1, %v9_v38, %v7_v37  ;;  %vm306_vm1 = vcmask 228464  }
  0x28   :  { %326 = vrot.lane.b32.xlu0 %v325_v36, %s417_s0  ;;  %v15_v41 = vsel %vm14_vm2, %v13_v39, %v11_v40  ;;  %vm328_vm2 = vcmask 212064  }
  0x29   :  { %17 = vst.msk [vmem:[%s700_s1] sm:$0xff] %vm16_vm4, %v15_v41  }
  0x78   :  { %v82_v42 = vpop.permute.xlu0 %81  }
  0x7a   :  { %v104_v43 = vpop.permute.xlu1 %103  }
  0x81   :  { %v126_v45 = vpop.permute.xlu1 %125  }
  0x82   :  { %v57_v44 = vpop.permute.xlu0 %56  }
  0x83   :  { %339 = vst.msk [vmem:[%s700_s1 + $0x8] sm:$0xff] %vm58_vm5, %v57_v44  }
  0x84   :  { %62 = vst.msk [vmem:[%s700_s1] sm:$0xff] %vm61_vm6, %v57_v44  }
  0x85   :  { %84 = vst.msk [vmem:[%s700_s1] sm:$0xff] %vm83_vm7, %v82_v42  }
  0x86   :  { %106 = vst.msk [vmem:[%s700_s1] sm:$0xff] %vm105_vm8, %v104_v43   ;;  %v148_v46 = vpop.permute.xlu0 %147  }
  0x87   :  { %128 = vst.msk [vmem:[%s700_s1] sm:$0xff] %vm127_vm9, %v126_v45   ;;  %v170_v47 = vpop.permute.xlu1 %169  }
  0x88   :  { %150 = vst.msk [vmem:[%s700_s1] sm:$0xff] %vm149_vm10, %v148_v46  }
  0x89   :  { %172 = vst.msk [vmem:[%s700_s1] sm:$0xff] %vm171_vm11, %v170_v47  }
  0x8a   :  { %v192_v48 = vpop.permute.xlu0 %191  }
  0x8b   :  { %364 = vst.msk [vmem:[%s700_s1 + $0x8] sm:$0xff] %vm193_vm12, %v192_v48  }
  0x8d   :  { %v215_v49 = vpop.permute.xlu1 %214  }
  0x8e   :  { %217 = vst.msk [vmem:[%s700_s1] sm:$0xff] %vm216_vm13, %v215_v49   ;;  %v237_v50 = vpop.permute.xlu0 %236  }
  0x8f   :  { %373 = vst.msk [vmem:[%s700_s1 + $0x8] sm:$0xff] %vm238_vm14, %v237_v50  }
  0x91   :  { %v260_v51 = vpop.permute.xlu1 %259  }
  0x92   :  { %262 = vst.msk [vmem:[%s700_s1] sm:$0xff] %vm261_vm15, %v260_v51  }
  0x94   :  { %v282_v52 = vpop.permute.xlu0 %281  }
  0x95   :  { %382 = vst.msk [vmem:[%s700_s1 + $0x8] sm:$0xff] %vm283_vm0, %v282_v52  }
  0x96   :  { %v305_v53 = vpop.permute.xlu1 %304  }
  0x97   :  { %307 = vst.msk [vmem:[%s700_s1] sm:$0xff] %vm306_vm1, %v305_v53  }
  0x9a   :  { %v327_v54 = vpop.permute.xlu0 %326  }
  0x9b   :  { %391 = vst.msk [vmem:[%s700_s1 + $0x8] sm:$0xff] %vm328_vm2, %v327_v54  }

// kernel: _forward_impl.1
= control target key start
LH: loop header
LB: loop body
LE: loop exit
PB: predicated region body
PF: predicated region fallthrough
CT: control target
= control target key end

     0   :  { %11 = vsyncpa [#allocation3], 0  ;;  %s1831_s0 = inlined_call_operand.vmem [shape: f32[3], index: 0, kind: input, shape index: {}]   ;;  %s1832_s1 = inlined_call_operand.vmem [shape: f32[3], index: 1, kind: input, shape index: {}]   ;;  %s1833_s2 = inlined_call_operand.vmem [shape: f32[8,196], index: 2, kind: input, shape index: {}]   ;;  %s1834_s3 = inlined_call_operand.vmem [shape: f32[196,49], index: 3, kind: input, shape index: {}]   ;;  %s1835_s4 = inlined_call_operand.vmem [shape: f32[24,196], index: 4, kind: output, shape index: {0}]   ;;  %s1836_s5 = inlined_call_operand.vmem [shape: f32[24,49], index: 5, kind: output, shape index: {1}]  }
   0x1   :  { %s19_s20 = sshll.u32 %s1831_s0, 4  ;;  %s20_s20 = int_to_ptr.vmem [resolvable:$true] %s19_s20 }
   0x2   :  { %12 = vsyncpa [#allocation5], 0  ;;  %s29_s23 = sshll.u32 %s1832_s1, 4  ;;  %s1151_s24 = scalar_lea.vmem %s20_s20, 16  ;;  %s30_s23 = int_to_ptr.vmem [resolvable:$true] %s29_s23 }
   0x3   :  { %p1152_p0 = scmp.ne.s32.totalorder %s20_s20, %s1151_s24  ;;  %p1156_p1 = scmp.lt.s32.totalorder %s20_s20, %s20_s20 }
   0x4   :  { %p1157_p2 = scmp.lt.s32.totalorder %s1151_s24, %s1151_s24 }
   0x6   :  { %p1158_p3 = por %p1157_p2, %p1156_p1 }
   0x8   :  { %p1159_p4 = pnand %p1158_p3, %p1152_p0 }
   0xa   :  { %1162 = shalt.err (!%p1159_p4)
}
   0xb   :  { %s1179_s25 = smov [#allocation2]   ;;  %s1163_s26 = scalar_lea.vmem %s30_s23, 16 }
   0xc   :  { %22 = dma.vmem_to_smem %s20_s20, 16, %s1179_s25, [#allocation3]  }
   0xd   :  { %p1164_p5 = scmp.ne.s32.totalorder %s30_s23, %s1163_s26  ;;  %p1168_p6 = scmp.lt.s32.totalorder %s30_s23, %s30_s23 }
   0xe   :  { %p1169_p7 = scmp.lt.s32.totalorder %s1163_s26, %s1163_s26 }
  0x10   :  { %p1170_p8 = por %p1169_p7, %p1168_p6 }
  0x12   :  { %p1171_p9 = pnand %p1170_p8, %p1164_p5 }
  0x14   :  { %1174 = shalt.err (!%p1171_p9)
}
  0x15   :  { %s1180_s0 = smov [#allocation4]  }
  0x16   :  { %32 = dma.vmem_to_smem %s30_s23, 16, %s1180_s0, [#allocation5]  }
  0x17   :  { %1175 = dma.done.wait [#allocation3], 16  }
  0x18   :  { %1176 = vsyncadd [#allocation3], 4294967280 }
  0x19   :  { %1177 = dma.done.wait [#allocation5], 16  }
  0x1a   :  { %1178 = vsyncadd [#allocation5], 4294967280 }
  0x1b   :  { %43 = sfence }
  0x1c   :  { %v1222_v0 = vld [vmem:[%s1834_s3] sm:$0xff]  ;;  %v1227_v1 = vld [vmem:[%s1834_s3 + $0x8] sm:$0xff]  ;;  %v1232_v2 = vld [vmem:[%s1834_s3 + $0x10] sm:$0xff]  ;;  %v1850_v3 = vmov 0.0|0.0   ;;  %vm71_vm0 = vcmask 556032   ;;  %vm75_vm1 = vcmask 1043456  }
  0x1d   :  { %922 = vmatprep.subr.bf16.mxu1 %v1850_v3  ;;  %1030 = vmatprep.subr.bf16.mxu0 %v1850_v3  ;;  %v80_v4 = vand.u32 4294901760, %v1222_v0  ;;  %v83_v5 = vand.u32 4294901760, %v1227_v1  ;;  %v1241_v6 = vld [vmem:[%s1834_s3 + $0x18] sm:$0xff]  ;;  %v86_v7 = vand.u32 4294901760, %v1232_v2  ;;  %v1248_v9 = vld [vmem:[%s1834_s3 + $0x20] sm:$0xff]  ;;  %v1253_v10 = vld [vmem:[%s1834_s3 + $0x28] sm:$0xff] }
  0x1e   :  { %v89_v8 = vand.u32 4294901760, %v1241_v6  ;;  %v92_v13 = vand.u32 4294901760, %v1248_v9  ;;  %v95_v14 = vand.u32 4294901760, %v1253_v10  ;;  %v1276_v15 = vld [vmem:[%s1834_s3 + $0x30] sm:$0xff]  ;;  %v1281_v16 = vld [vmem:[%s1834_s3 + $0x38] sm:$0xff]  ;;  %v1298_v20 = vld [vmem:[%s1834_s3 + $0x40] sm:$0xff] }
  0x1f   :  { %v1259_v11 = vpack.c.bf16 %v83_v5, %v80_v4  ;;  %v98_v18 = vand.u32 4294901760, %v1276_v15  ;;  %v101_v19 = vand.u32 4294901760, %v1281_v16  ;;  %v1303_v21 = vld [vmem:[%s1834_s3 + $0x48] sm:$0xff]  ;;  %v104_v23 = vand.u32 4294901760, %v1298_v20  ;;  %v1320_v25 = vld [vmem:[%s1834_s3 + $0x50] sm:$0xff]  ;;  %v1325_v26 = vld [vmem:[%s1834_s3 + $0x58] sm:$0xff] }
  0x20   :  { %v1267_v12 = vpack.c.bf16 %v89_v8, %v86_v7  ;;  %v1289_v17 = vpack.c.bf16 %v95_v14, %v92_v13  ;;  %v107_v24 = vand.u32 4294901760, %v1303_v21  ;;  %v1330_v27 = vld [vmem:[%s1833_s2 + $0x8] sm:$0xff]  ;;  %v1852_v29 = vand.u32 4294901760, %v1320_v25  ;;  %v1349_v32 = vld [vmem:[%s1834_s3 + $0x60] sm:$0xff]  ;;  %v1376_v39 = vld [vmem:[%s1834_s3 + $0x70] sm:$0xff]  ;;  %s918_s0 = sld [smem:[#allocation2 + $0x1]] }
  0x21   :  { %924 = vmatpush1.bf16.msra.mxu1 %v1259_v11  ;;  %1032 = vmatpush1.bf16.msra.mxu0 %v1259_v11  ;;  %v1311_v22 = vpack.c.bf16 %v101_v19, %v98_v18  ;;  %1861 = vst [vmem:[#allocation8_spill] sm:$0xff] %v1330_v27  ;;  %v1849_v30 = vand.u32 4294901760, %v1325_v26  ;;  %v73_v31 = vsel %vm71_vm0, %v1330_v27, 0  ;;  %v1354_v33 = vld [vmem:[%s1834_s3 + $0x68] sm:$0xff]  ;;  %v1846_v37 = vand.u32 4294901760, %v1349_v32  ;;  %v1381_v40 = vld [vmem:[%s1834_s3 + $0x78] sm:$0xff] }
  0x22   :  { %925 = vmatprep.subr.bf16.mxu1 %v1850_v3  ;;  %1033 = vmatprep.subr.bf16.mxu0 %v1850_v3  ;;  %v1338_v28 = vpack.c.bf16 %v107_v24, %v104_v23  ;;  %v1356_v34 = vand.u32 4294901760, %v73_v31  ;;  %v1845_v38 = vand.u32 4294901760, %v1354_v33  ;;  %v1844_v44 = vand.u32 4294901760, %v1376_v39  ;;  %v1400_v46 = vld [vmem:[%s1834_s3 + $0x80] sm:$0xff]  ;;  %v1405_v47 = vld [vmem:[%s1834_s3 + $0x88] sm:$0xff]  ;;  %v1422_v52 = vld [vmem:[%s1834_s3 + $0x90] sm:$0xff] }
  0x23   :  { %v1367_v36 = vpack.c.bf16 %v1849_v30, %v1852_v29  ;;  %v1843_v45 = vand.u32 4294901760, %v1381_v40  ;;  %v1842_v50 = vand.u32 4294901760, %v1400_v46  ;;  %v1841_v51 = vand.u32 4294901760, %v1405_v47  ;;  %v1427_v53 = vld [vmem:[%s1834_s3 + $0x98] sm:$0xff]  ;;  %v1432_v54 = vld [vmem:[%s1833_s2] sm:$0xff]  ;;  %v1454_v59 = vld [vmem:[%s1834_s3 + $0xa8] sm:$0xff] }
  0x24   :  { %v1359_v35 = vsub.f32 %v73_v31, %v1356_v34  ;;  %v1391_v43 = vpack.c.bf16 %v1845_v38, %v1846_v37  ;;  %1862 = vst [vmem:[#allocation9_spill] sm:$0xff] %v1432_v54  ;;  %v1838_v56 = vand.u32 4294901760, %v1422_v52  ;;  %v1837_v57 = vand.u32 4294901760, %v1427_v53  ;;  %v1449_v58 = vld [vmem:[%s1834_s3 + $0xa0] sm:$0xff]  ;;  %s920_s1 = sld [smem:[#allocation2 + $0x2]]  ;;  %s851_s27 = sld [smem:[#allocation4]] }
  0x25   :  { %927 = vmatpush1.bf16.msra.mxu1 %v1267_v12  ;;  %1035 = vmatpush1.bf16.msra.mxu0 %v1267_v12  ;;  %v1413_v49 = vpack.c.bf16 %v1843_v45, %v1844_v44  ;;  %v1440_v55 = vpack.c.bf16 %v1841_v51, %v1842_v50  ;;  %v1457_v60 = vand.u32 4294901760, %v1432_v54  ;;  %v1462_v61 = vsub.f32 %v1222_v0, %v80_v4  ;;  %v1489_v4 = vld [vmem:[%s1834_s3 + $0xb8] sm:$0xff]  ;;  %s919_s28 = sld [smem:[#allocation4 + $0x1]]  ;;  %s921_s29 = sld [smem:[#allocation4 + $0x2]] }
  0x26   :  { %928 = vmatprep.subr.bf16.mxu1 %v1850_v3  ;;  %1036 = vmatprep.subr.bf16.mxu0 %v1850_v3  ;;  %v170_v41 = vand.u32 4294901760, %v1359_v35  ;;  %v1467_v62 = vsub.f32 %v1227_v1, %v83_v5  ;;  %v1475_v63 = vpack.c.bf16 %v1837_v57, %v1838_v56  ;;  %v1840_v31 = vand.u32 4294901760, %v1449_v58  ;;  %v1484_v1 = vld [vmem:[%s1834_s3 + $0xb0] sm:$0xff]  ;;  %v70_v56 = vld [vmem:[%s1834_s3 + $0xc0] sm:$0xf]  ;;  %s850_s3 = sld [smem:[#allocation2]] }
  0x27   :  { %v1839_v0 = vand.u32 4294901760, %v1454_v59  ;;  %v1494_v5 = vsub.f32 %v1232_v2, %v86_v7  ;;  %v1847_v7 = vand.u32 4294901760, %v1489_v4  ;;  %v1533_v50 = vsub.f32 %v1253_v10, %v95_v14 }
  0x28   :  { %v171_v42 = vsub.f32 %v1359_v35, %v170_v41  ;;  %597 = vmatprep.mubr.f32.mxu0 %v170_v41  ;;  %v1499_v41 = vsub.f32 %v1241_v6, %v89_v8  ;;  %v194_v57 = vand.u32 4294901760, %v1467_v62  ;;  %v1848_v6 = vand.u32 4294901760, %v1484_v1 }
  0x29   :  { %930 = vmatpush1.bf16.msra.mxu1 %v1289_v17  ;;  %1038 = vmatpush1.bf16.msra.mxu0 %v1289_v17  ;;  %v1513_v2 = vpack.c.bf16 %v1839_v0, %v1840_v31  ;;  %v1522_v8 = vsub.f32 %v1248_v9, %v92_v13  ;;  %v201_v31 = vand.u32 4294901760, %v1494_v5  ;;  %v1548_v44 = vsub.f32 %v1276_v15, %v98_v18 }
  0x2a   :  { %931 = vmatprep.subr.bf16.mxu1 %v1850_v3  ;;  %1039 = vmatprep.subr.bf16.mxu0 %v1850_v3  ;;  %v172_v48 = vand.u32 4294901760, %v171_v42  ;;  %v1503_v42 = vsub.f32 %v1432_v54, %v1457_v60  ;;  %v208_v51 = vand.u32 4294901760, %v1499_v41  ;;  %v195_v9 = vsub.f32 %v1467_v62, %v194_v57 }
  0x2b   :  { %v1543_v13 = vpack.c.bf16 %v1847_v7, %v1848_v6  ;;  %v1552_v10 = vsel %vm75_vm1, %v70_v56, 0  ;;  %v202_v38 = vsub.f32 %v1494_v5, %v201_v31  ;;  %v215_v7 = vand.u32 4294901760, %v1522_v8 }
  0x2c   :  { %173 = vmatprep.mubr.f32.mxu1 %v172_v48  ;;  %1863 = vst [vmem:[#allocation10_spill] sm:$0xff] %v1503_v42  ;;  %v187_v48 = vand.u32 4294901760, %v1462_v61  ;;  %v176_v0 = vand.u32 4294901760, %v1503_v42  ;;  %v209_v37 = vsub.f32 %v1499_v41, %v208_v51  ;;  %v1561_v6 = vsub.f32 %v1281_v16, %v101_v19 }
  0x2d   :  { %933 = vmatpush1.bf16.msra.mxu1 %v1311_v22  ;;  %1041 = vmatpush1.bf16.msra.mxu0 %v1311_v22  ;;  %1864 = vst [vmem:[#allocation11_spill] sm:$0xff] %v1543_v13  ;;  %v196_v18 = vand.u32 4294901760, %v195_v9  ;;  %v222_v30 = vand.u32 4294901760, %v1533_v50  ;;  %v1567_v56 = vand.u32 4294901760, %v1552_v10  ;;  %v1577_v16 = vsub.f32 %v1303_v21, %v107_v24 }
  0x2e   :  { %934 = vmatprep.subr.bf16.mxu1 %v1850_v3  ;;  %1042 = vmatprep.subr.bf16.mxu0 %v1850_v3  ;;  %v188_v45 = vsub.f32 %v1462_v61, %v187_v48  ;;  %v177_v14 = vsub.f32 %v1503_v42, %v176_v0  ;;  %v1859_v19 = vmov 0.0   ;;  %v203_v29 = vand.u32 4294901760, %v202_v38 }
  0x2f   :  { %v210_v27 = vand.u32 4294901760, %v209_v37  ;;  %v216_v54 = vsub.f32 %v1522_v8, %v215_v7  ;;  %v1865_v21 = vand.u32 4294901760, %v1320_v25  ;;  %v1866_v37 = vand.u32 4294901760, %v1325_v26 }
  0x30   :  { %v189_v15 = vand.u32 4294901760, %v188_v45  ;;  %v1067_v45 = vpack.c.bf16 %v194_v57, %v187_v48  ;;  %v178_v9 = vand.u32 4294901760, %v177_v14  ;;  %v1867_v57 = vmov 0.0|0.0  }
  0x31   :  { %936 = vmatpush1.bf16.msra.mxu1 %v1338_v28  ;;  %1044 = vmatpush1.bf16.msra.mxu0 %v1338_v28  ;;  %v1590_v24 = vsub.f32 %v1320_v25, %v1865_v21  ;;  %v1595_v38 = vsub.f32 %v1325_v26, %v1866_v37  ;;  %v962_v48 = vpack.c.bf16 %v210_v27, %v203_v29  ;;  %v217_v25 = vand.u32 4294901760, %v216_v54 }
  0x32   :  { %937 = vmatprep.subr.bf16.mxu1 %v1850_v3  ;;  %1045 = vmatprep.subr.bf16.mxu0 %v1850_v3  ;;  %v959_v42 = vpack.c.bf16 %v196_v18, %v189_v15  ;;  %v1070_v14 = vpack.c.bf16 %v208_v51, %v201_v31  ;;  %v250_v18 = vand.u32 4294901760, %v1577_v16  ;;  %v1869_v29 = vand.u32 4294901760, %v1354_v33 }
  0x33   :  { %v1073_v54 = vpack.c.bf16 %v222_v30, %v215_v7  ;;  %v264_v37 = vand.u32 4294901760, %v1595_v38  ;;  %v1871_v7 = vand.u32 4294901760, %v1381_v40  ;;  %vm868_vm8 = vcmask 400384  }
  0x34   :  { %v1613_v51 = vsub.f32 %v1354_v33, %v1869_v29  ;;  %v1870_v33 = vand.u32 4294901760, %v1376_v39 }
  0x35   :  { %939 = vmatpush1.bf16.msra.mxu1 %v1367_v36  ;;  %1047 = vmatpush1.bf16.msra.mxu0 %v1367_v36  ;;  %v265_v29 = vsub.f32 %v1595_v38, %v264_v37 }
  0x36   :  { %940 = vmatprep.subr.bf16.mxu1 %v1850_v3  ;;  %1048 = vmatprep.subr.bf16.mxu0 %v1850_v3 }
  0x39   :  { %942 = vmatpush1.bf16.msra.mxu1 %v1391_v43  ;;  %1050 = vmatpush1.bf16.msra.mxu0 %v1391_v43 }
  0x3a   :  { %943 = vmatprep.subr.bf16.mxu1 %v1850_v3  ;;  %1051 = vmatprep.subr.bf16.mxu0 %v1850_v3 }
  0x3d   :  { %945 = vmatpush1.bf16.msra.mxu1 %v1413_v49  ;;  %1053 = vmatpush1.bf16.msra.mxu0 %v1413_v49 }
  0x3e   :  { %946 = vmatprep.subr.bf16.mxu1 %v1850_v3  ;;  %1054 = vmatprep.subr.bf16.mxu0 %v1850_v3 }
  0x41   :  { %948 = vmatpush1.bf16.msra.mxu1 %v1440_v55  ;;  %1056 = vmatpush1.bf16.msra.mxu0 %v1440_v55 }
  0x42   :  { %949 = vmatprep.subr.bf16.mxu1 %v1850_v3  ;;  %1057 = vmatprep.subr.bf16.mxu0 %v1850_v3 }
  0x45   :  { %951 = vmatpush1.bf16.msra.mxu1 %v1475_v63  ;;  %1059 = vmatpush1.bf16.msra.mxu0 %v1475_v63 }
  0x46   :  { %952 = vmatprep.subr.bf16.mxu1 %v1850_v3  ;;  %1060 = vmatprep.subr.bf16.mxu0 %v1850_v3 }
  0x49   :  { %954 = vmatpush1.bf16.msra.mxu1 %v1513_v2  ;;  %1062 = vmatpush1.bf16.msra.mxu0 %v1513_v2 }
  0x4a   :  { %955 = vmatprep.subr.bf16.mxu1 %v1850_v3  ;;  %1063 = vmatprep.subr.bf16.mxu0 %v1850_v3  ;;  %v1572_v3 = vsub.f32 %v1298_v20, %v104_v23  ;;  %v223_v20 = vsub.f32 %v1533_v50, %v222_v30  ;;  %v229_v23 = vand.u32 4294901760, %v1548_v44  ;;  %v1626_v30 = vsub.f32 %v1376_v39, %v1870_v33 }
  0x4b   :  { %v278_v39 = vand.u32 4294901760, %v1613_v51 }
  0x4c   :  { %v243_v15 = vand.u32 4294901760, %v1572_v3  ;;  %v224_v21 = vand.u32 4294901760, %v223_v20 }
  0x4d   :  { %957 = vmatpush1.bf16.msra.mxu1 %v1543_v13  ;;  %1065 = vmatpush1.bf16.msra.mxu0 %v1543_v13  ;;  %v236_v13 = vand.u32 4294901760, %v1561_v6  ;;  %v279_v33 = vsub.f32 %v1613_v51, %v278_v39 }
  0x4e   :  { %151 = vmatprep.subr.mxu1 %v1859_v19  ;;  %577 = vmatprep.subr.mxu0 %v1859_v19  ;;  %v230_v19 = vsub.f32 %v1548_v44, %v229_v23  ;;  %v244_v31 = vsub.f32 %v1572_v3, %v243_v15 }
  0x4f   :  { %v237_v26 = vsub.f32 %v1561_v6, %v236_v13 }
  0x51   :  { %153 = vmatpush1.msra.mxu1 %v1567_v56  ;;  %579 = vmatpush1.msra.mxu0 %v1567_v56  ;;  %v238_v20 = vand.u32 4294901760, %v237_v26  ;;  %v1076_v26 = vpack.c.bf16 %v236_v13, %v229_v23  ;;  %v1079_v13 = vpack.c.bf16 %v250_v18, %v243_v15 }
  0x52   :  { %958 = vmatprep.subr.bf16.mxu1 %v1867_v57  ;;  %1066 = vmatprep.subr.bf16.mxu0 %v1867_v57 }
  0x53   :  { %179 = vmatmul.mubr.f32.vlgmr.msra.gmra.mrb[0].mxu1 %v178_v9  ;;  %601 = vmatmul.mubr.f32.vlgmr.msra.gmra.mrb[0].mxu0 %v176_v0  ;;  %v1868_v0 = vand.u32 4294901760, %v1349_v32  ;;  %v231_v9 = vand.u32 4294901760, %v230_v19 }
  0x54   :  { %960 = vmatpush1.bf16.msra.mxu1 %v959_v42  ;;  %1068 = vmatpush1.bf16.msra.mxu0 %v1067_v45  ;;  %v251_v42 = vsub.f32 %v1577_v16, %v250_v18  ;;  %v257_v45 = vand.u32 4294901760, %v1590_v24  ;;  %v1875_v18 = vand.u32 4294901760, %v1427_v53 }
  0x55   :  { %961 = vmatprep.subr.bf16.mxu1 %v1867_v57  ;;  %1069 = vmatprep.subr.bf16.mxu0 %v1867_v57  ;;  %v1608_v27 = vsub.f32 %v1349_v32, %v1868_v0  ;;  %v965_v32 = vpack.c.bf16 %v224_v21, %v217_v25  ;;  %v1631_v0 = vsub.f32 %v1381_v40, %v1871_v7  ;;  %v1872_v40 = vand.u32 4294901760, %v1400_v46 }
  0x56   :  { %374 = vmatprep.mubr.f32.mxu1 %v1356_v34  ;;  %746 = vmatprep.mubr.f32.mxu0 %v1356_v34  ;;  %v258_v19 = vsub.f32 %v1590_v24, %v257_v45  ;;  %v968_v21 = vpack.c.bf16 %v238_v20, %v231_v9  ;;  %v266_v20 = vand.u32 4294901760, %v265_v29  ;;  %v285_v7 = vand.u32 4294901760, %v1626_v30 }
  0x57   :  { %v271_v25 = vand.u32 4294901760, %v1608_v27 }
  0x58   :  { %963 = vmatpush1.bf16.msra.mxu1 %v962_v48  ;;  %1071 = vmatpush1.bf16.msra.mxu0 %v1070_v14  ;;  %v245_v48 = vand.u32 4294901760, %v244_v31  ;;  %v252_v14 = vand.u32 4294901760, %v251_v42  ;;  %v1642_v31 = vsub.f32 %v1400_v46, %v1872_v40  ;;  %v1873_v42 = vand.u32 4294901760, %v1405_v47 }
  0x59   :  { %964 = vmatprep.subr.bf16.mxu1 %v1867_v57  ;;  %1072 = vmatprep.subr.bf16.mxu0 %v1867_v57  ;;  %v259_v23 = vand.u32 4294901760, %v258_v19  ;;  %v272_v9 = vsub.f32 %v1608_v27, %v271_v25  ;;  %v292_v46 = vand.u32 4294901760, %v1631_v0  ;;  %v280_v40 = vand.u32 4294901760, %v279_v33 }
  0x5b   :  { %v273_v19 = vand.u32 4294901760, %v272_v9  ;;  %v974_v29 = vpack.c.bf16 %v266_v20, %v259_v23 }
  0x5c   :  { %966 = vmatpush1.bf16.msra.mxu1 %v965_v32  ;;  %1074 = vmatpush1.bf16.msra.mxu0 %v1073_v54  ;;  %v1647_v32 = vsub.f32 %v1405_v47, %v1873_v42  ;;  %v971_v54 = vpack.c.bf16 %v252_v14, %v245_v48  ;;  %v1874_v47 = vand.u32 4294901760, %v1422_v52  ;;  %v1663_v48 = vsub.f32 %v1427_v53, %v1875_v18 }
  0x5d   :  { %967 = vmatprep.subr.bf16.mxu1 %v1867_v57  ;;  %1075 = vmatprep.subr.bf16.mxu0 %v1867_v57  ;;  %v1082_v14 = vpack.c.bf16 %v264_v37, %v257_v45  ;;  %v286_v42 = vsub.f32 %v1626_v30, %v285_v7  ;;  %v1876_v53 = vand.u32 4294901760, %v1449_v58  ;;  %v1877_v37 = vand.u32 4294901760, %v1454_v59 }
  0x5e   :  { %v1658_v15 = vsub.f32 %v1422_v52, %v1874_v47  ;;  %v293_v52 = vsub.f32 %v1631_v0, %v292_v46  ;;  %v977_v33 = vpack.c.bf16 %v280_v40, %v273_v19 }
  0x5f   :  { %v1674_v45 = vsub.f32 %v1449_v58, %v1876_v53  ;;  %v287_v47 = vand.u32 4294901760, %v286_v42  ;;  %v320_v58 = vand.u32 4294901760, %v1663_v48 }
  0x60   :  { %969 = vmatpush1.bf16.msra.mxu1 %v968_v21  ;;  %1077 = vmatpush1.bf16.msra.mxu0 %v1076_v26  ;;  %v299_v21 = vand.u32 4294901760, %v1642_v31  ;;  %v306_v26 = vand.u32 4294901760, %v1647_v32  ;;  %v313_v20 = vand.u32 4294901760, %v1658_v15  ;;  %v294_v18 = vand.u32 4294901760, %v293_v52 }
  0x61   :  { %970 = vmatprep.subr.bf16.mxu1 %v1867_v57  ;;  %1078 = vmatprep.subr.bf16.mxu0 %v1867_v57  ;;  %v327_v40 = vand.u32 4294901760, %v1674_v45  ;;  %v1088_v52 = vpack.c.bf16 %v292_v46, %v285_v7 }
  0x62   :  { %v300_v23 = vsub.f32 %v1642_v31, %v299_v21  ;;  %v307_v9 = vsub.f32 %v1647_v32, %v306_v26  ;;  %v980_v42 = vpack.c.bf16 %v294_v18, %v287_v47 }
  0x64   :  { %972 = vmatpush1.bf16.msra.mxu1 %v971_v54  ;;  %1080 = vmatpush1.bf16.msra.mxu0 %v1079_v13  ;;  %v1679_v54 = vsub.f32 %v1454_v59, %v1877_v37  ;;  %v1085_v13 = vpack.c.bf16 %v278_v39, %v271_v25  ;;  %v1878_v59 = vand.u32 4294901760, %v1484_v1  ;;  %v1879_v39 = vand.u32 4294901760, %v1489_v4 }
  0x65   :  { %973 = vmatprep.subr.bf16.mxu1 %v1867_v57  ;;  %1081 = vmatprep.subr.bf16.mxu0 %v1867_v57  ;;  %v308_v19 = vand.u32 4294901760, %v307_v9  ;;  %v321_v37 = vsub.f32 %v1663_v48, %v320_v58  ;;  %v328_v9 = vsub.f32 %v1674_v45, %v327_v40 }
  0x66   :  { %v1690_v25 = vsub.f32 %v1484_v1, %v1878_v59  ;;  %v1695_v53 = vsub.f32 %v1489_v4, %v1879_v39  ;;  %v334_v1 = vand.u32 4294901760, %v1679_v54  ;;  %v1091_v59 = vpack.c.bf16 %v306_v26, %v299_v21 }
  0x67   :  { %v322_v39 = vand.u32 4294901760, %v321_v37  ;;  %v1094_v21 = vpack.c.bf16 %v320_v58, %v313_v20  ;;  %v329_v26 = vand.u32 4294901760, %v328_v9 }
  0x68   :  { %975 = vmatpush1.bf16.msra.mxu1 %v974_v29  ;;  %1083 = vmatpush1.bf16.msra.mxu0 %v1082_v14  ;;  %v301_v14 = vand.u32 4294901760, %v300_v23  ;;  %v314_v29 = vsub.f32 %v1658_v15, %v313_v20  ;;  %v341_v7 = vand.u32 4294901760, %v1690_v25  ;;  %v348_v46 = vand.u32 4294901760, %v1695_v53 }
  0x69   :  { %976 = vmatprep.subr.bf16.mxu1 %v1867_v57  ;;  %1084 = vmatprep.subr.bf16.mxu0 %v1867_v57 }
  0x6a   :  { %v983_v4 = vpack.c.bf16 %v308_v19, %v301_v14  ;;  %v315_v23 = vand.u32 4294901760, %v314_v29  ;;  %v342_v14 = vsub.f32 %v1690_v25, %v341_v7  ;;  %v349_v19 = vsub.f32 %v1695_v53, %v348_v46 }
  0x6b   :  { %v1097_v29 = vpack.c.bf16 %v334_v1, %v327_v40  ;;  %v1100_v37 = vpack.c.bf16 %v348_v46, %v341_v7 }
  0x6c   :  { %978 = vmatpush1.bf16.msra.mxu1 %v977_v33  ;;  %1086 = vmatpush1.bf16.msra.mxu0 %v1085_v13  ;;  %v335_v13 = vsub.f32 %v1679_v54, %v334_v1  ;;  %v1711_v33 = vsub.f32 %v1552_v10, %v1567_v56  ;;  %v986_v47 = vpack.c.bf16 %v322_v39, %v315_v23  ;;  %v343_v10 = vand.u32 4294901760, %v342_v14 }
  0x6d   :  { %979 = vmatprep.subr.bf16.mxu1 %v1867_v57  ;;  %1087 = vmatprep.subr.bf16.mxu0 %v1867_v57  ;;  %v1880_v1 = vmov 0.0   ;;  %v998_v23 = vpack.c.bf16 %v1499_v41, %v1494_v5 }
  0x6e   :  { %v336_v18 = vand.u32 4294901760, %v335_v13  ;;  %v355_v20 = vand.u32 4294901760, %v1711_v33 }
  0x70   :  { %981 = vmatpush1.bf16.msra.mxu1 %v980_v42  ;;  %1089 = vmatpush1.bf16.msra.mxu0 %v1088_v52  ;;  %v989_v42 = vpack.c.bf16 %v336_v18, %v329_v26  ;;  %v350_v52 = vand.u32 4294901760, %v349_v19 }
  0x71   :  { %982 = vmatprep.subr.bf16.mxu1 %v1867_v57  ;;  %1090 = vmatprep.subr.bf16.mxu0 %v1867_v57 }
  0x72   :  { %v992_v58 = vpack.c.bf16 %v350_v52, %v343_v10 }
  0x74   :  { %984 = vmatpush1.bf16.msra.mxu1 %v983_v4  ;;  %1092 = vmatpush1.bf16.msra.mxu0 %v1091_v59  ;;  %v356_v4 = vsub.f32 %v1711_v33, %v355_v20  ;;  %v995_v59 = vpack.c.bf16 %v1467_v62, %v1462_v61  ;;  %v1001_v61 = vpack.c.bf16 %v1533_v50, %v1522_v8  ;;  %v872_v50 = vstv %s918_s0 }
  0x75   :  { %985 = vmatprep.subr.bf16.mxu1 %v1867_v57  ;;  %1093 = vmatprep.subr.bf16.mxu0 %v1867_v57  ;;  %v875_v8 = vstv %s919_s28 }
  0x76   :  { %v357_v40 = vand.u32 4294901760, %v356_v4 }
  0x78   :  { %987 = vmatpush1.bf16.msra.mxu1 %v986_v47  ;;  %1095 = vmatpush1.bf16.msra.mxu0 %v1094_v21 }
  0x79   :  { %988 = vmatprep.subr.bf16.mxu1 %v1867_v57  ;;  %1096 = vmatprep.subr.bf16.mxu0 %v1867_v57 }
  0x7c   :  { %990 = vmatpush1.bf16.msra.mxu1 %v989_v42  ;;  %1098 = vmatpush1.bf16.msra.mxu0 %v1097_v29 }
  0x7d   :  { %991 = vmatprep.subr.bf16.mxu1 %v1867_v57  ;;  %1099 = vmatprep.subr.bf16.mxu0 %v1867_v57 }
  0x80   :  { %993 = vmatpush1.bf16.msra.mxu1 %v992_v58  ;;  %1101 = vmatpush1.bf16.msra.mxu0 %v1100_v37 }
  0x81   :  { %352 = vmatprep.subr.mxu1 %v1880_v1  ;;  %726 = vmatprep.subr.mxu0 %v1880_v1 }
  0x84   :  { %358 = vmatpush1.msra.mxu1 %v357_v40  ;;  %730 = vmatpush1.msra.mxu0 %v355_v20 }
  0x85   :  { %994 = vmatprep.subr.bf16.mxu1 %v1867_v57  ;;  %1102 = vmatprep.subr.bf16.mxu0 %v1867_v57 }
  0x86   :  { %376 = vmatmul.mubr.f32.vlgmr.msra.gmra.mrb[0].mxu1 %v1457_v60  ;;  %748 = vmatmul.mubr.f32.vlgmr.msra.gmra.mrb[0].mxu0 %v1457_v60 }
  0x87   :  { %996 = vmatpush1.bf16.msra.mxu1 %v995_v59  ;;  %1104 = vmatpush1.bf16.msra.mxu0 %v1259_v11  ;;  %v1004_v11 = vpack.c.bf16 %v1561_v6, %v1548_v44  ;;  %v1882_v44 = vld [vmem:[#allocation10_spill] sm:$0xff]  ;;  %v855_v6 = vstv %s851_s27 }
  0x88   :  { %997 = vmatprep.subr.bf16.mxu1 %v1867_v57  ;;  %1105 = vmatprep.subr.bf16.mxu0 %v1867_v57 }
  0x89   :  { %497 = vmatprep.mubr.f32.mxu1 %v1359_v35  ;;  %843 = vmatprep.mubr.f32.mxu0 %v1356_v34  ;;  %v1022_v34 = vpack.c.bf16 %v1663_v48, %v1658_v15  ;;  %v1025_v35 = vpack.c.bf16 %v1679_v54, %v1674_v45 }
  0x8b   :  { %999 = vmatpush1.bf16.msra.mxu1 %v998_v23  ;;  %1107 = vmatpush1.bf16.msra.mxu0 %v1267_v12  ;;  %v1007_v12 = vpack.c.bf16 %v1577_v16, %v1572_v3  ;;  %v1013_v3 = vpack.c.bf16 %v1613_v51, %v1608_v27  ;;  %v894_v51 = vstv %s921_s29 }
  0x8c   :  { %1000 = vmatprep.subr.bf16.mxu1 %v1867_v57  ;;  %1108 = vmatprep.subr.bf16.mxu0 %v1867_v57 }
  0x8f   :  { %1002 = vmatpush1.bf16.msra.mxu1 %v1001_v61  ;;  %1110 = vmatpush1.bf16.msra.mxu0 %v1289_v17  ;;  %v1010_v17 = vpack.c.bf16 %v1595_v38, %v1590_v24 }
  0x90   :  { %1003 = vmatprep.subr.bf16.mxu1 %v1867_v57  ;;  %1111 = vmatprep.subr.bf16.mxu0 %v1867_v57 }
  0x93   :  { %1005 = vmatpush1.bf16.msra.mxu1 %v1004_v11  ;;  %1113 = vmatpush1.bf16.msra.mxu0 %v1311_v22  ;;  %v1016_v22 = vpack.c.bf16 %v1631_v0, %v1626_v30 }
  0x94   :  { %1006 = vmatprep.subr.bf16.mxu1 %v1867_v57  ;;  %1114 = vmatprep.subr.bf16.mxu0 %v1867_v57 }
  0x97   :  { %1008 = vmatpush1.bf16.msra.mxu1 %v1007_v12  ;;  %1116 = vmatpush1.bf16.msra.mxu0 %v1338_v28  ;;  %v1019_v28 = vpack.c.bf16 %v1647_v32, %v1642_v31 }
  0x98   :  { %1009 = vmatprep.subr.bf16.mxu1 %v1867_v57  ;;  %1117 = vmatprep.subr.bf16.mxu0 %v1867_v57 }
  0x9b   :  { %1011 = vmatpush1.bf16.msra.mxu1 %v1010_v17  ;;  %1119 = vmatpush1.bf16.msra.mxu0 %v1367_v36  ;;  %v1028_v36 = vpack.c.bf16 %v1695_v53, %v1690_v25 }
  0x9c   :  { %1012 = vmatprep.subr.bf16.mxu1 %v1867_v57  ;;  %1120 = vmatprep.subr.bf16.mxu0 %v1867_v57 }
  0x9f   :  { %1014 = vmatpush1.bf16.msra.mxu1 %v1013_v3  ;;  %1122 = vmatpush1.bf16.msra.mxu0 %v1391_v43  ;;  %v1881_v43 = vld [vmem:[#allocation11_spill] sm:$0xff] }
  0xa0   :  { %1015 = vmatprep.subr.bf16.mxu1 %v1867_v57  ;;  %1123 = vmatprep.subr.bf16.mxu0 %v1867_v57 }
  0xa3   :  { %1017 = vmatpush1.bf16.msra.mxu1 %v1016_v22  ;;  %1125 = vmatpush1.bf16.msra.mxu0 %v1413_v49  ;;  %v852_v49 = vstv %s850_s3 }
  0xa4   :  { %1018 = vmatprep.subr.bf16.mxu1 %v1867_v57  ;;  %1126 = vmatprep.subr.bf16.mxu0 %v1867_v57 }
  0xa7   :  { %1020 = vmatpush1.bf16.msra.mxu1 %v1019_v28  ;;  %1128 = vmatpush1.bf16.msra.mxu0 %v1440_v55  ;;  %v1883_v55 = vld [vmem:[#allocation9_spill] sm:$0xff] }
  0xa8   :  { %1021 = vmatprep.subr.bf16.mxu1 %v1867_v57  ;;  %1129 = vmatprep.subr.bf16.mxu0 %v1867_v57  ;;  %v853_v62 = vmul.f32 %v852_v49, %v1883_v55  ;;  %v873_v41 = vmul.f32 %v872_v50, %v1883_v55 }
  0xaa   :  { %v876_v24 = vadd.f32 %v875_v8, %v873_v41 }
  0xab   :  { %1023 = vmatpush1.bf16.msra.mxu1 %v1022_v34  ;;  %1131 = vmatpush1.bf16.msra.mxu0 %v1475_v63  ;;  %v1884_v63 = vld [vmem:[#allocation8_spill] sm:$0xff] }
  0xac   :  { %1024 = vmatprep.subr.bf16.mxu1 %v1867_v57  ;;  %1132 = vmatprep.subr.bf16.mxu0 %v1867_v57  ;;  %v854_v5 = vmul.f32 %v852_v49, %v1884_v63  ;;  %vm878_vm4 = vcmp.gt.f32.partialorder %v876_v24, 0.0  ;;  %v880_v31 = vmul.f32 0.7, %v876_v24 }
  0xae   :  { %v857_v16 = vadd.f32 %v855_v6, %v854_v5  ;;  %v882_v54 = vsel %vm878_vm4, %v876_v24, %v880_v31 }
  0xaf   :  { %1026 = vmatpush1.bf16.msra.mxu1 %v1025_v35  ;;  %1134 = vmatpush1.bf16.msra.mxu0 %v1513_v2  ;;  %v874_v2 = vmul.f32 %v872_v50, %v1884_v63  ;;  %884 = vst [vmem:[%s1835_s4 + $0x10] sm:$0xff] %v882_v54 }
  0xb0   :  { %1027 = vmatprep.subr.bf16.mxu1 %v1867_v57  ;;  %1135 = vmatprep.subr.bf16.mxu0 %v1867_v57  ;;  %vm859_vm3 = vcmp.gt.f32.partialorder %v857_v16, 0.0  ;;  %v861_v0 = vmul.f32 0.7, %v857_v16 }
  0xb1   :  { %v877_v38 = vadd.f32 %v875_v8, %v874_v2 }
  0xb2   :  { %v863_v15 = vsel %vm859_vm3, %v857_v16, %v861_v0 }
  0xb3   :  { %1029 = vmatpush1.bf16.msra.mxu1 %v1028_v36  ;;  %1137 = vmatpush1.bf16.msra.mxu0 %v1881_v43  ;;  %vm879_vm5 = vcmp.gt.f32.partialorder %v877_v38, 0.0  ;;  %v881_v48 = vmul.f32 0.7, %v877_v38  ;;  %865 = vst.msk [vmem:[%s1835_s4 + $0x8] sm:$0xff] %vm71_vm0, %v863_v15 }
  0xb4   :  { %477 = vmatprep.subr.mxu1 %v1880_v1  ;;  %825 = vmatprep.subr.mxu0 %v1880_v1 }
  0xb5   :  { %v883_v53 = vsel %vm879_vm5, %v877_v38, %v881_v48 }
  0xb6   :  { %885 = vst.msk [vmem:[%s1835_s4 + $0x18] sm:$0xff] %vm71_vm0, %v883_v53 }
  0xb7   :  { %480 = vmatpush1.msra.mxu1 %v1711_v33  ;;  %827 = vmatpush1.msra.mxu0 %v1567_v56  ;;  %v891_v56 = vstv %s920_s1 }
  0xb8   :  { %500 = vmatmul.mubr.f32.vlgmr.msra.gmra.mrb[0].mxu1 %v1882_v44  ;;  %845 = vmatmul.mubr.f32.vlgmr.msra.gmra.mrb[0].mxu0 %v1457_v60  ;;  %v856_v60 = vadd.f32 %v855_v6, %v853_v62  ;;  %v892_v57 = vmul.f32 %v891_v56, %v1883_v55  ;;  %v893_v27 = vmul.f32 %v891_v56, %v1884_v63 }
  0xba   :  { %vm858_vm2 = vcmp.gt.f32.partialorder %v856_v60, 0.0  ;;  %v860_v30 = vmul.f32 0.7, %v856_v60  ;;  %v895_v45 = vadd.f32 %v894_v51, %v892_v57  ;;  %v896_v25 = vadd.f32 %v894_v51, %v893_v27 }
  0xbc   :  { %v862_v32 = vsel %vm858_vm2, %v856_v60, %v860_v30  ;;  %vm897_vm6 = vcmp.gt.f32.partialorder %v895_v45, 0.0  ;;  %v899_v9 = vmul.f32 0.7, %v895_v45  ;;  %vm898_vm7 = vcmp.gt.f32.partialorder %v896_v25, 0.0 }
  0xbd   :  { %864 = vst [vmem:[%s1835_s4] sm:$0xff] %v862_v32  ;;  %v900_v39 = vmul.f32 0.7, %v896_v25 }
  0xbe   :  { %v901_v13 = vsel %vm897_vm6, %v895_v45, %v899_v9 }
  0xbf   :  { %v902_v7 = vsel %vm898_vm7, %v896_v25, %v900_v39  ;;  %903 = vst [vmem:[%s1835_s4 + $0x20] sm:$0xff] %v901_v13 }
  0xc0   :  { %904 = vst.msk [vmem:[%s1835_s4 + $0x28] sm:$0xff] %vm71_vm0, %v902_v7 }
 0x18b   :  { %v501_v46 = vpop.f32.mrb[0].mxu1  ;;  %v846_v33 = vpop.f32.mrb[0].mxu0 }
 0x18c   :  { %v1138_v21 = vadd.f32 %v846_v33, %v501_v46  ;;  %v503_v26 = vpop.f32.mrb[1].mxu1  ;;  %v848_v47 = vpop.f32.mrb[1].mxu0 }
 0x18e   :  { %v866_v18 = vmul.f32 %v1138_v21, %v852_v49  ;;  %v886_v14 = vmul.f32 %v1138_v21, %v872_v50  ;;  %v905_v19 = vmul.f32 %v1138_v21, %v891_v56 }
 0x190   :  { %v867_v29 = vadd.f32 %v866_v18, %v855_v6  ;;  %v887_v42 = vadd.f32 %v886_v14, %v875_v8  ;;  %v906_v10 = vadd.f32 %v905_v19, %v894_v51 }
 0x192   :  { %869 = vst.msk [vmem:[%s1836_s5] sm:$0xff] %vm868_vm8, %v867_v29  ;;  %888 = vst.msk [vmem:[%s1836_s5 + $0x8] sm:$0xff] %vm868_vm8, %v887_v42 }
 0x193   :  { %907 = vst.msk [vmem:[%s1836_s5 + $0x10] sm:$0xff] %vm868_vm8, %v906_v10 }
 0x194   :  { %916 = vsyncpa [#allocation3], 1 }
 0x195   :  { %917 = vsyncpa [#allocation5], 1 }

</bundles_post_ra>
